<compile_context>
chip_gen: v7x
topology: tpu7x:2x2x1
jax: 0.10.0
libtpu: 0.0.40
codegen_flags: <defaults>
</compile_context>

<pallas_src>
import functools

import jax
import jax.numpy as jnp
from jax.experimental import pallas as pl
from jax.experimental.pallas import tpu as pltpu

LANE = 128
SUBLANE = 8
B_GRANULE = 16        # batch-tile granule; multiple of the bf16 sublane pack (16)


def _round_up(n, m):
    return (n + m - 1) // m * m


def _cdiv(a, b):
    return -(-a // b)


def _tensorcores_per_chip():
    """Best-effort TensorCore count (v7x: 2 per chip; v5e/v6e: 1)."""
    try:
        kind = jax.devices()[0].device_kind.lower()
    except Exception:
        return 1
    return 2 if "v7" in kind else 1


# ----------------------------------------------------------------------------
# Kernel
# ----------------------------------------------------------------------------
def _actor_kernel(x_ref, w1_ref, b1_ref, w2_ref, b2_ref, w3_ref, b3_ref,
                  out_ref, *, max_action):
    # Layer 1: bf16 MXU matmul, f32 accumulation, f32 epilogue (bias + relu).
    h1 = jnp.dot(x_ref[...], w1_ref[...], preferred_element_type=jnp.float32)
    h1 = jnp.maximum(h1 + b1_ref[...], 0.0)

    # Layer 2.
    h2 = jnp.dot(h1.astype(jnp.bfloat16), w2_ref[...],
                 preferred_element_type=jnp.float32)
    h2 = jnp.maximum(h2 + b2_ref[...], 0.0)

    # Layer 3: bias + max_action * tanh, stored to a lane-dense bf16 block.
    h3 = jnp.dot(h2.astype(jnp.bfloat16), w3_ref[...],
                 preferred_element_type=jnp.float32)
    h3 = h3 + b3_ref[...]
    out_ref[...] = (max_action * jnp.tanh(h3)).astype(out_ref.dtype)


# ----------------------------------------------------------------------------
# Parameter packing: pad to lane multiples once, cast weights to bf16.
# ----------------------------------------------------------------------------
def pack_actor_params(params):
    """Pad hidden/output dims to multiples of 128 and cast weights to bf16."""
    w1, b1 = params["w1"], params["b1"]
    w2, b2 = params["w2"], params["b2"]
    w3, b3 = params["w3"], params["b3"]
    h1, h2, a = w1.shape[1], w2.shape[1], w3.shape[1]
    h1p, h2p, ap = (_round_up(d, LANE) for d in (h1, h2, a))

    def pad2(m, rows, cols):
        return jnp.pad(m, ((0, rows - m.shape[0]), (0, cols - m.shape[1])))

    return {
        "w1": pad2(w1, w1.shape[0], h1p).astype(jnp.bfloat16),
        "b1": jnp.pad(b1, (0, h1p - h1)).reshape(1, h1p).astype(jnp.float32),
        "w2": pad2(w2, h1p, h2p).astype(jnp.bfloat16),
        "b2": jnp.pad(b2, (0, h2p - h2)).reshape(1, h2p).astype(jnp.float32),
        "w3": pad2(w3, h2p, ap).astype(jnp.bfloat16),
        "b3": jnp.pad(b3, (0, ap - a)).reshape(1, ap).astype(jnp.float32),
        "action_dim": a,
    }


# ----------------------------------------------------------------------------
# Forward wrapper
# ----------------------------------------------------------------------------
def actor_forward(x, packed, max_action, *, block_b=1024):
    """x: (B, state_dim) f32.  packed: output of pack_actor_params."""
    B, S = x.shape
    h1p = packed["w1"].shape[1]
    h2p = packed["w2"].shape[1]
    ap = packed["w3"].shape[1]
    a = packed["action_dim"]

    # --- Batch tiling --------------------------------------------------------
    # n_steps caps rows/step at ~block_b; on v7x force a multiple of 2 steps
    # (when the batch is big enough) so ("parallel",) shards over both TCs.
    # tb = ceil(B / n_steps) rounded to the batch granule, so total padding is
    # < B_GRANULE * n_steps rows (not the up-to-2x of round_up(B, tb)).
    min_steps = _tensorcores_per_chip()
    n_steps = max(_cdiv(B, block_b), 1)
    if min_steps > 1 and B >= min_steps * B_GRANULE:
        n_steps = _round_up(max(n_steps, min_steps), min_steps)
    tb = _round_up(_cdiv(B, n_steps), B_GRANULE)
    b_pad = n_steps * tb

    # Cast activations to bf16 here: halves the x DMA, MXU consumes bf16
    # directly; accumulation and the relu/tanh epilogues stay f32 in-kernel.
    x = x.astype(jnp.bfloat16)
    if b_pad != B:
        x = jnp.pad(x, ((0, b_pad - B), (0, 0)))

    kernel = functools.partial(_actor_kernel, max_action=float(max_action))

    flops = 2 * b_pad * (S * h1p + h1p * h2p + h2p * ap)
    bytes_accessed = (
        b_pad * S * 2 + b_pad * ap * 2                                     # bf16 x, out
        + 2 * (packed["w1"].size + packed["w2"].size + packed["w3"].size)  # bf16 weights
        + 4 * (h1p + h2p + ap))                                            # f32 biases

    out = pl.pallas_call(
        kernel,
        out_shape=jax.ShapeDtypeStruct((b_pad, ap), jnp.bfloat16),
        grid=(n_steps,),
        in_specs=[
            pl.BlockSpec((tb, S), lambda i: (i, 0)),       # x: streams over batch
            pl.BlockSpec((S, h1p), lambda i: (0, 0)),      # weights/biases: constant
            pl.BlockSpec((1, h1p), lambda i: (0, 0)),      #   block index -> stay
            pl.BlockSpec((h1p, h2p), lambda i: (0, 0)),    #   VMEM-resident across
            pl.BlockSpec((1, h2p), lambda i: (0, 0)),      #   grid steps (no re-DMA)
            pl.BlockSpec((h2p, ap), lambda i: (0, 0)),
            pl.BlockSpec((1, ap), lambda i: (0, 0)),
        ],
        out_specs=pl.BlockSpec((tb, ap), lambda i: (i, 0)),  # lane-dense (tb, 128)
        compiler_params=pltpu.CompilerParams(
            dimension_semantics=("parallel",)),              # v7x: batch over 2 TCs
        cost_estimate=pl.CostEstimate(
            flops=flops, transcendentals=b_pad * ap,
            bytes_accessed=bytes_accessed),
    )(x, packed["w1"], packed["b1"], packed["w2"], packed["b2"],
      packed["w3"], packed["b3"])

    # Slice back to the real batch / action_dim and return f32.
    return out[:B, :a].astype(jnp.float32)


# ----------------------------------------------------------------------------
# Init + references
# ----------------------------------------------------------------------------
def init_actor_params(key, state_dim, action_dim, h1=400, h2=300):
    """Deterministic synthetic init (uniform, PyTorch-Linear-like scale)."""
    ks = jax.random.split(key, 6)

    def lin(kw, kb, fan_in, fan_out):
        bound = 1.0 / jnp.sqrt(fan_in)
        w = jax.random.uniform(kw, (fan_in, fan_out), jnp.float32, -bound, bound)
        b = jax.random.uniform(kb, (fan_out,), jnp.float32, -bound, bound)
        return w, b

    w1, b1 = lin(ks[0], ks[1], state_dim, h1)
    w2, b2 = lin(ks[2], ks[3], h1, h2)
    w3, b3 = lin(ks[4], ks[5], h2, action_dim)
    return {"w1": w1, "b1": b1, "w2": w2, "b2": b2, "w3": w3, "b3": b3}


def actor_reference(x, params, max_action):
    """Pure-f32 reference (matches the PyTorch module semantics)."""
    h = jnp.maximum(x @ params["w1"] + params["b1"], 0.0)
    h = jnp.maximum(h @ params["w2"] + params["b2"], 0.0)
    return max_action * jnp.tanh(h @ params["w3"] + params["b3"])


def actor_reference_bf16(x, params, max_action):
    """Reference mirroring the kernel's bf16 matmul inputs / f32 accumulation."""
    def q(v):
        return v.astype(jnp.bfloat16).astype(jnp.float32)
    h = jnp.maximum(jnp.dot(q(x), q(params["w1"])) + params["b1"], 0.0)
    h = jnp.maximum(jnp.dot(q(h), q(params["w2"])) + params["b2"], 0.0)
    return max_action * jnp.tanh(jnp.dot(q(h), q(params["w3"])) + params["b3"])


# ----------------------------------------------------------------------------
if __name__ == "__main__":
    key = jax.random.PRNGKey(0)
    k_params, k_x = jax.random.split(key)

    batch = 2
    state_dim = 16
    action_dim = 4
    max_action = 2.0

    params = init_actor_params(k_params, state_dim, action_dim)
    packed = pack_actor_params(params)   # do once; reuse across rollout steps
    x = jax.random.normal(k_x, (batch, state_dim), jnp.float32)

    out = jax.block_until_ready(actor_forward(x, packed, max_action))

    assert out.shape == (batch, action_dim)
    assert out.dtype == jnp.float32

    # Tight check vs. a reference applying the same bf16 input quantization
    # (kernel additionally rounds the output through bf16; tolerance covers it).
    ref_q = actor_reference_bf16(x, params, max_action)
    assert jnp.allclose(out, ref_q, atol=2e-2, rtol=2e-2), "mismatch vs bf16 reference"

    # Loose check vs. the pure-f32 PyTorch-equivalent reference (bf16 weights /
    # activations introduce ~1% relative error by design).
    ref_f32 = actor_reference(x, params, max_action)
    assert jnp.allclose(out, ref_f32, atol=6e-2, rtol=6e-2), "mismatch vs f32 reference"

    print("KERNEL_OK")
</pallas_src>

<mosaic_0001>
module attributes {stable_mosaic.version = 11 : i64} {
  func.func @_actor_kernel(%arg0: i32, %arg1: memref<16x16xbf16, #tpu.memory_space<vmem>>, %arg2: memref<16x512xbf16, #tpu.memory_space<vmem>>, %arg3: memref<1x512xf32, #tpu.memory_space<vmem>>, %arg4: memref<512x384xbf16, #tpu.memory_space<vmem>>, %arg5: memref<1x384xf32, #tpu.memory_space<vmem>>, %arg6: memref<384x128xbf16, #tpu.memory_space<vmem>>, %arg7: memref<1x128xf32, #tpu.memory_space<vmem>>, %arg8: memref<16x128xbf16, #tpu.memory_space<vmem>>) attributes {dimension_semantics = [#tpu.dimension_semantics<parallel>], iteration_bounds = array<i64: 1>, scalar_prefetch = 0 : i64, scratch_operands = 0 : i64, tpu.core_type = #tpu.core_type<tc>, window_params = [{transform_indices = @transform_0, window_bounds = array<i64: 16, 16>}, {pipeline_mode = #tpu.pipeline_mode<synchronous>, transform_indices = @transform_1, window_bounds = array<i64: 16, 512>}, {pipeline_mode = #tpu.pipeline_mode<synchronous>, transform_indices = @transform_2, window_bounds = array<i64: 1, 512>}, {pipeline_mode = #tpu.pipeline_mode<synchronous>, transform_indices = @transform_3, window_bounds = array<i64: 512, 384>}, {pipeline_mode = #tpu.pipeline_mode<synchronous>, transform_indices = @transform_4, window_bounds = array<i64: 1, 384>}, {pipeline_mode = #tpu.pipeline_mode<synchronous>, transform_indices = @transform_5, window_bounds = array<i64: 384, 128>}, {pipeline_mode = #tpu.pipeline_mode<synchronous>, transform_indices = @transform_6, window_bounds = array<i64: 1, 128>}, {transform_indices = @transform_7, window_bounds = array<i64: 16, 128>}]} {
    %c0 = arith.constant 0 : index
    %c0_0 = arith.constant 0 : index
    %0 = vector.load %arg1[%c0, %c0_0] : memref<16x16xbf16, #tpu.memory_space<vmem>>, vector<16x16xbf16>
    %c0_1 = arith.constant 0 : index
    %c0_2 = arith.constant 0 : index
    %1 = vector.load %arg2[%c0_1, %c0_2] : memref<16x512xbf16, #tpu.memory_space<vmem>>, vector<16x512xbf16>
    %cst = arith.constant dense<0.000000e+00> : vector<16x512xf32>
    %2 = tpu.matmul %0, %1, %cst {dimension_numbers = #tpu.dot_dimension_numbers<[1], [0], [0], [1], [0, 0, 1, 1], [], []>} : vector<16x16xbf16>, vector<16x512xbf16>, vector<16x512xf32> -> vector<16x512xf32>
    %c0_3 = arith.constant 0 : index
    %c0_4 = arith.constant 0 : index
    %3 = vector.load %arg3[%c0_3, %c0_4] : memref<1x512xf32, #tpu.memory_space<vmem>>, vector<1x512xf32>
    %4 = vector.broadcast %3 : vector<1x512xf32> to vector<16x512xf32>
    %5 = arith.addf %2, %4 : vector<16x512xf32>
    %cst_5 = arith.constant 0.000000e+00 : f32
    %6 = vector.broadcast %cst_5 : f32 to vector<16x512xf32>
    %7 = arith.maximumf %5, %6 : vector<16x512xf32>
    %8 = arith.truncf %7 : vector<16x512xf32> to vector<16x512xbf16>
    %c0_6 = arith.constant 0 : index
    %c0_7 = arith.constant 0 : index
    %9 = vector.load %arg4[%c0_6, %c0_7] : memref<512x384xbf16, #tpu.memory_space<vmem>>, vector<512x384xbf16>
    %cst_8 = arith.constant dense<0.000000e+00> : vector<16x384xf32>
    %10 = tpu.matmul %8, %9, %cst_8 {dimension_numbers = #tpu.dot_dimension_numbers<[1], [0], [0], [1], [0, 0, 1, 1], [], []>} : vector<16x512xbf16>, vector<512x384xbf16>, vector<16x384xf32> -> vector<16x384xf32>
    %c0_9 = arith.constant 0 : index
    %c0_10 = arith.constant 0 : index
    %11 = vector.load %arg5[%c0_9, %c0_10] : memref<1x384xf32, #tpu.memory_space<vmem>>, vector<1x384xf32>
    %12 = vector.broadcast %11 : vector<1x384xf32> to vector<16x384xf32>
    %13 = arith.addf %10, %12 : vector<16x384xf32>
    %cst_11 = arith.constant 0.000000e+00 : f32
    %14 = vector.broadcast %cst_11 : f32 to vector<16x384xf32>
    %15 = arith.maximumf %13, %14 : vector<16x384xf32>
    %16 = arith.truncf %15 : vector<16x384xf32> to vector<16x384xbf16>
    %c0_12 = arith.constant 0 : index
    %c0_13 = arith.constant 0 : index
    %17 = vector.load %arg6[%c0_12, %c0_13] : memref<384x128xbf16, #tpu.memory_space<vmem>>, vector<384x128xbf16>
    %cst_14 = arith.constant dense<0.000000e+00> : vector<16x128xf32>
    %18 = tpu.matmul %16, %17, %cst_14 {dimension_numbers = #tpu.dot_dimension_numbers<[1], [0], [0], [1], [0, 0, 1, 1], [], []>} : vector<16x384xbf16>, vector<384x128xbf16>, vector<16x128xf32> -> vector<16x128xf32>
    %c0_15 = arith.constant 0 : index
    %c0_16 = arith.constant 0 : index
    %19 = vector.load %arg7[%c0_15, %c0_16] : memref<1x128xf32, #tpu.memory_space<vmem>>, vector<1x128xf32>
    %20 = vector.broadcast %19 : vector<1x128xf32> to vector<16x128xf32>
    %21 = arith.addf %18, %20 : vector<16x128xf32>
    %22 = math.tanh %21 : vector<16x128xf32>
    %cst_17 = arith.constant 2.000000e+00 : f32
    %23 = vector.broadcast %cst_17 : f32 to vector<16x128xf32>
    %24 = arith.mulf %23, %22 : vector<16x128xf32>
    %25 = arith.truncf %24 : vector<16x128xf32> to vector<16x128xbf16>
    %c0_18 = arith.constant 0 : index
    %c0_19 = arith.constant 0 : index
    %26 = vector.load %arg8[%c0_18, %c0_19] : memref<16x128xbf16, #tpu.memory_space<vmem>>, vector<16x128xbf16>
    tpu.vector_store %arg8[%c0_18, %c0_19], %25 {strides = array<i32>} : memref<16x128xbf16, #tpu.memory_space<vmem>>, vector<16x128xbf16>,
    return
  }
  func.func @transform_0(%arg0: i32) -> (i32, i32) {
    %c0_i32 = arith.constant 0 : i32
    %c0_i32_0 = arith.constant 0 : i32
    return %arg0, %c0_i32 : i32, i32
  }
  func.func @transform_1(%arg0: i32) -> (i32, i32) {
    %c0_i32 = arith.constant 0 : i32
    %c0_i32_0 = arith.constant 0 : i32
    %c0_i32_1 = arith.constant 0 : i32
    return %c0_i32, %c0_i32_0 : i32, i32
  }
  func.func @transform_2(%arg0: i32) -> (i32, i32) {
    %c0_i32 = arith.constant 0 : i32
    %c0_i32_0 = arith.constant 0 : i32
    %c0_i32_1 = arith.constant 0 : i32
    return %c0_i32, %c0_i32_0 : i32, i32
  }
  func.func @transform_3(%arg0: i32) -> (i32, i32) {
    %c0_i32 = arith.constant 0 : i32
    %c0_i32_0 = arith.constant 0 : i32
    %c0_i32_1 = arith.constant 0 : i32
    return %c0_i32, %c0_i32_0 : i32, i32
  }
  func.func @transform_4(%arg0: i32) -> (i32, i32) {
    %c0_i32 = arith.constant 0 : i32
    %c0_i32_0 = arith.constant 0 : i32
    %c0_i32_1 = arith.constant 0 : i32
    return %c0_i32, %c0_i32_0 : i32, i32
  }
  func.func @transform_5(%arg0: i32) -> (i32, i32) {
    %c0_i32 = arith.constant 0 : i32
    %c0_i32_0 = arith.constant 0 : i32
    %c0_i32_1 = arith.constant 0 : i32
    return %c0_i32, %c0_i32_0 : i32, i32
  }
  func.func @transform_6(%arg0: i32) -> (i32, i32) {
    %c0_i32 = arith.constant 0 : i32
    %c0_i32_0 = arith.constant 0 : i32
    %c0_i32_1 = arith.constant 0 : i32
    return %c0_i32, %c0_i32_0 : i32, i32
  }
  func.func @transform_7(%arg0: i32) -> (i32, i32) {
    %c0_i32 = arith.constant 0 : i32
    %c0_i32_0 = arith.constant 0 : i32
    return %arg0, %c0_i32 : i32, i32
  }
}

</mosaic_0001>

<bundles_post_ra>
// kernel: tpu_custom_call.1
= control target key start
LH: loop header
LB: loop body
LE: loop exit
PB: predicated region body
PF: predicated region fallthrough
CT: control target
= control target key end

     0   :  { %12 = vsyncpa [#allocation3], 0  ;;  %s2084_s0 = inlined_call_operand.hbm [shape: bf16[16,16], index: 0, kind: input, shape index: {}]   ;;  %s2085_s1 = inlined_call_operand.hbm [shape: bf16[16,512], index: 1, kind: input, shape index: {}]   ;;  %s2086_s2 = inlined_call_operand.vmem [shape: f32[1,512], index: 2, kind: input, shape index: {}]   ;;  %s2087_s3 = inlined_call_operand.hbm [shape: bf16[512,384], index: 3, kind: input, shape index: {}]   ;;  %s2088_s4 = inlined_call_operand.vmem [shape: f32[1,384], index: 4, kind: input, shape index: {}]   ;;  %s2089_s5 = inlined_call_operand.hbm [shape: bf16[384,128], index: 5, kind: input, shape index: {}]   ;;  %s2090_s6 = inlined_call_operand.vmem [shape: f32[1,128], index: 6, kind: input, shape index: {}]   ;;  %s2091_s7 = inlined_call_operand.hbm [shape: bf16[16,128], index: 7, kind: output, shape index: {}]  }
   0x1   :  { %13 = vsyncpa [#allocation6], 0 }
   0x2   :  { %14 = vsyncpa [#allocation9], 0 }
   0x3   :  { %15 = vsyncpa [#allocation4], 0  ;;  %s1921_s24 = smov [#allocation5]   ;;  %s1803_s28 = scalar_lea.hbm %s2085_s1, 512 }
   0x4   :  { %s33_s25 = sshll.u32 %s1921_s24, 4  ;;  %p1804_p0 = scmp.ne.s32.totalorder %s2085_s1, %s1803_s28  ;;  %s34_s25 = int_to_ptr.vmem [resolvable:$true] %s33_s25 }
   0x5   :  { %p1807_p1 = scmp.lt.u32.totalorder %s1803_s28, %s2085_s1 }
   0x7   :  { %p1809_p2 = pnand %p1807_p1, %p1804_p0 }
   0x9   :  { %1812 = shalt.err (!%p1809_p2)
}
   0xa   :  { %s1813_s10 = scalar_lea.vmem %s34_s25, 512  ;;  %p1818_p4 = scmp.lt.s32.totalorder %s34_s25, %s34_s25 }
   0xb   :  { %p1814_p3 = scmp.ne.s32.totalorder %s34_s25, %s1813_s10  ;;  %p1819_p5 = scmp.lt.s32.totalorder %s1813_s10, %s1813_s10 }
   0xd   :  { %p1820_p6 = por %p1819_p5, %p1818_p4 }
   0xf   :  { %p1821_p7 = pnand %p1820_p6, %p1814_p3 }
  0x11   :  { %1824 = shalt.err (!%p1821_p7)
}
  0x12   :  { %s1922_s11 = smov 256   ;;  %s1923_s12 = smov 16  }
  0x13   :  { %39 = dma.hbm_to_vmem [thread:$0]  %s2085_s1, 512, %s34_s25, [#allocation6], %s1922_s11, %s1922_s11, %s1923_s12  }
  0x14   :  { %s1924_s15 = smov [#allocation2]   ;;  %s1825_s19 = scalar_lea.hbm %s2084_s0, 128 }
  0x15   :  { %s21_s16 = sshll.u32 %s1924_s15, 4  ;;  %p1826_p8 = scmp.ne.s32.totalorder %s2084_s0, %s1825_s19  ;;  %s22_s16 = int_to_ptr.vmem [resolvable:$true] %s21_s16 }
  0x16   :  { %p1829_p9 = scmp.lt.u32.totalorder %s1825_s19, %s2084_s0 }
  0x18   :  { %p1831_p10 = pnand %p1829_p9, %p1826_p8 }
  0x1a   :  { %1834 = shalt.err (!%p1831_p10)
}
  0x1b   :  { %s1835_s24 = scalar_lea.vmem %s22_s16, 128  ;;  %p1840_p12 = scmp.lt.s32.totalorder %s22_s16, %s22_s16 }
  0x1c   :  { %p1836_p11 = scmp.ne.s32.totalorder %s22_s16, %s1835_s24  ;;  %p1841_p13 = scmp.lt.s32.totalorder %s1835_s24, %s1835_s24 }
  0x1e   :  { %p1842_p0 = por %p1841_p13, %p1840_p12 }
  0x20   :  { %p1843_p1 = pnand %p1842_p0, %p1836_p11 }
  0x22   :  { %1846 = shalt.err (!%p1843_p1)
}
  0x23   :  { %s1925_s1 = smov 64   ;;  %s1926_s25 = smov 4  }
  0x24   :  { %27 = dma.hbm_to_vmem [thread:$0]  %s2084_s0, 128, %s22_s16, [#allocation3], %s1925_s1, %s1925_s1, %s1926_s25  }
  0x25   :  { %s1927_s28 = smov [#allocation7]   ;;  %s1847_s9 = scalar_lea.hbm %s2087_s3, 12288 }
  0x26   :  { %s47_s29 = sshll.u32 %s1927_s28, 4  ;;  %p1848_p2 = scmp.ne.s32.totalorder %s2087_s3, %s1847_s9  ;;  %s48_s29 = int_to_ptr.vmem [resolvable:$true] %s47_s29 }
  0x27   :  { %p1851_p3 = scmp.lt.u32.totalorder %s1847_s9, %s2087_s3 }
  0x29   :  { %p1853_p4 = pnand %p1851_p3, %p1848_p2 }
  0x2b   :  { %1856 = shalt.err (!%p1853_p4)
}
  0x2c   :  { %s1857_s14 = scalar_lea.vmem %s48_s29, 12288  ;;  %p1862_p6 = scmp.lt.s32.totalorder %s48_s29, %s48_s29 }
  0x2d   :  { %p1858_p5 = scmp.ne.s32.totalorder %s48_s29, %s1857_s14  ;;  %p1863_p7 = scmp.lt.s32.totalorder %s1857_s14, %s1857_s14 }
  0x2f   :  { %p1864_p8 = por %p1863_p7, %p1862_p6 }
  0x31   :  { %p1865_p9 = pnand %p1864_p8, %p1858_p5 }
  0x33   :  { %1868 = shalt.err (!%p1865_p9)
}
  0x34   :  { %s1928_s0 = smov 192   ;;  %s1929_s15 = smov 12  }
  0x35   :  { %53 = dma.hbm_to_vmem [thread:$0]  %s2087_s3, 12288, %s48_s29, [#allocation6], %s1928_s0, %s1928_s0, %s1929_s15  }
  0x36   :  { %s1930_s18 = smov [#allocation8]   ;;  %s1869_s22 = scalar_lea.hbm %s2089_s5, 3072 }
  0x37   :  { %s61_s19 = sshll.u32 %s1930_s18, 4  ;;  %p1870_p10 = scmp.ne.s32.totalorder %s2089_s5, %s1869_s22  ;;  %s62_s19 = int_to_ptr.vmem [resolvable:$true] %s61_s19 }
  0x38   :  { %p1873_p11 = scmp.lt.u32.totalorder %s1869_s22, %s2089_s5 }
  0x3a   :  { %p1875_p12 = pnand %p1873_p11, %p1870_p10 }
  0x3c   :  { %1878 = shalt.err (!%p1875_p12)
}
  0x3d   :  { %s1879_s28 = scalar_lea.vmem %s62_s19, 3072  ;;  %p1884_p0 = scmp.lt.s32.totalorder %s62_s19, %s62_s19 }
  0x3e   :  { %p1880_p13 = scmp.ne.s32.totalorder %s62_s19, %s1879_s28  ;;  %p1885_p1 = scmp.lt.s32.totalorder %s1879_s28, %s1879_s28 }
  0x40   :  { %p1886_p2 = por %p1885_p1, %p1884_p0 }
  0x42   :  { %p1887_p3 = pnand %p1886_p2, %p1880_p13 }
  0x44   :  { %1890 = shalt.err (!%p1887_p3)
}
  0x45   :  { %67 = dma.hbm_to_vmem [thread:$0]  %s2089_s5, 3072, %s62_s19, [#allocation9], %s1925_s1, %s1925_s1, %s1926_s25  }
  0x46   :  { %1913 = dma.done.wait [#allocation3], 128  }
  0x47   :  { %1914 = vsyncadd [#allocation3], 4294967168 }
  0x48   :  { %1915 = dma.done.wait [#allocation6], 12800  }
  0x49   :  { %1916 = vsyncadd [#allocation6], 4294954496 }
  0x4a   :  { %1917 = dma.done.wait [#allocation9], 3072  }
  0x4b   :  { %1918 = vsyncadd [#allocation9], 4294964224  ;;  %v1931_v0 = vmov 0   ;;  %v1640_v1 = vld [vmem:[#allocation5 + $0x4] ss:$16 sps:$4 sm:$0xff]   ;;  %v1643_v3 = vld [vmem:[#allocation2] sm:$0xff]   ;;  %v91_v56 = vlaneseq }
  0x4c   :  { %172 = vmatprep.mubr.bf16.mxu0 %v1931_v0  ;;  %215 = vmatprep.mubr.bf16.mxu1 %v1931_v0  ;;  %v1642_v2 = vld [vmem:[#allocation5] ss:$16 sps:$4 sm:$0xff]   ;;  %vm136_vm0 = vcmask 130048   ;;  %v1644_v4 = vld [vmem:[#allocation5 + $0xc] ss:$16 sps:$4 sm:$0xff]   ;;  %vm1933_vm1 = vmmov 0  }
  0x4d   :  { %140 = vmatprep.subr.bf16.mxu0 %v1640_v1  ;;  %v1646_v5 = vld [vmem:[#allocation5 + $0x8] ss:$16 sps:$4 sm:$0xff]   ;;  %v1647_v6 = vld [vmem:[#allocation7] ss:$12 sps:$4 sm:$0xff]   ;;  %v1649_v7 = vld [vmem:[#allocation7 + $0x4] ss:$12 sps:$4 sm:$0xff]   ;;  %183 = vmatprep.subr.bf16.mxu1 %v1644_v4 }
  0x4e   :  { %141 = vmatpush1.bf16.msra.mxu0 %v1642_v2  ;;  %184 = vmatpush1.bf16.msra.mxu1 %v1646_v5  ;;  %v1652_v8 = vld [vmem:[#allocation7 + $0x1c] ss:$12 sps:$4 sm:$0xff]   ;;  %v1650_v9 = vld [vmem:[#allocation7 + $0x18] ss:$12 sps:$4 sm:$0xff]   ;;  %v1655_v10 = vld [vmem:[#allocation7 + $0x34] ss:$12 sps:$4 sm:$0xff]  }
  0x4f   :  { %895 = vmatprep.subr.bf16.mxu0 %v1649_v7  ;;  %v1653_v11 = vld [vmem:[#allocation7 + $0x30] ss:$12 sps:$4 sm:$0xff]   ;;  %v1658_v12 = vld [vmem:[#allocation7 + $0x4c] ss:$12 sps:$4 sm:$0xff]   ;;  %v1656_v13 = vld [vmem:[#allocation7 + $0x48] ss:$12 sps:$4 sm:$0xff]  }
  0x50   :  { %v1661_v14 = vld [vmem:[#allocation7 + $0x64] ss:$12 sps:$4 sm:$0xff]   ;;  %v1674_v15 = vld [vmem:[#allocation7 + $0xc8] ss:$12 sps:$4 sm:$0xff]   ;;  %v1659_v17 = vld [vmem:[#allocation7 + $0x60] ss:$12 sps:$4 sm:$0xff]  }
  0x51   :  { %1391 = vmatmul.mubr.msk.bf16.vlgmr.msra.gmra.mrb[0].mxu0 %vm136_vm0, %v1643_v3  ;;  %1392 = vmatmul.mubr.msk.bf16.vlgmr.msra.gmra.mrb[0].mxu1 %vm136_vm0, %v1643_v3  ;;  %v1675_v16 = vld [vmem:[#allocation7 + $0x8] ss:$12 sps:$4 sm:$0xff]   ;;  %v1679_v18 = vld [vmem:[#allocation7 + $0xe0] ss:$12 sps:$4 sm:$0xff]   ;;  %v1662_v21 = vld [vmem:[#allocation7 + $0x78] ss:$12 sps:$4 sm:$0xff]  }
  0x52   :  { %896 = vmatpush1.bf16.msra.mxu0 %v1647_v6  ;;  %1523 = vmatprep.subr.bf16.mxu1 %v1674_v15  ;;  %v1680_v19 = vld [vmem:[#allocation7 + $0x20] ss:$12 sps:$4 sm:$0xff]   ;;  %v1664_v20 = vld [vmem:[#allocation7 + $0x7c] ss:$12 sps:$4 sm:$0xff]   ;;  %v1684_v22 = vld [vmem:[#allocation7 + $0xf8] ss:$12 sps:$4 sm:$0xff]  }
  0x53   :  { %897 = vmatprep.subr.bf16.mxu0 %v1652_v8  ;;  %1524 = vmatpush3.bf16.msra.mxu1 %v1675_v16  ;;  %v1685_v23 = vld [vmem:[#allocation7 + $0x38] ss:$12 sps:$4 sm:$0xff]   ;;  %v1667_v24 = vld [vmem:[#allocation7 + $0x94] ss:$12 sps:$4 sm:$0xff]   ;;  %v1689_v25 = vld [vmem:[#allocation7 + $0x110] ss:$12 sps:$4 sm:$0xff]  }
  0x54   :  { %1525 = vmatprep.subr.bf16.mxu1 %v1679_v18  ;;  %v1690_v26 = vld [vmem:[#allocation7 + $0x50] ss:$12 sps:$4 sm:$0xff]   ;;  %v1670_v28 = vld [vmem:[#allocation7 + $0xac] ss:$12 sps:$4 sm:$0xff]   ;;  %v1694_v29 = vld [vmem:[#allocation7 + $0x128] ss:$12 sps:$4 sm:$0xff]  }
  0x55   :  { %v1665_v27 = vld [vmem:[#allocation7 + $0x90] ss:$12 sps:$4 sm:$0xff]   ;;  %v1668_v30 = vld [vmem:[#allocation7 + $0xa8] ss:$12 sps:$4 sm:$0xff]   ;;  %v1699_v33 = vld [vmem:[#allocation7 + $0x140] ss:$12 sps:$4 sm:$0xff]  }
  0x56   :  { %898 = vmatpush1.bf16.msra.mxu0 %v1650_v9  ;;  %v1695_v31 = vld [vmem:[#allocation7 + $0x68] ss:$12 sps:$4 sm:$0xff]   ;;  %v1673_v32 = vld [vmem:[#allocation7 + $0xc4] ss:$12 sps:$4 sm:$0xff]   ;;  %v1671_v34 = vld [vmem:[#allocation7 + $0xc0] ss:$12 sps:$4 sm:$0xff]  }
  0x57   :  { %899 = vmatprep.subr.bf16.mxu0 %v1655_v10  ;;  %1526 = vmatpush3.bf16.msra.mxu1 %v1680_v19  ;;  %v1700_v35 = vld [vmem:[#allocation7 + $0x80] ss:$12 sps:$4 sm:$0xff]   ;;  %v1678_v36 = vld [vmem:[#allocation7 + $0xdc] ss:$12 sps:$4 sm:$0xff]   ;;  %v1676_v37 = vld [vmem:[#allocation7 + $0xd8] ss:$12 sps:$4 sm:$0xff]  }
  0x58   :  { %1527 = vmatprep.subr.bf16.mxu1 %v1684_v22  ;;  %v1683_v38 = vld [vmem:[#allocation7 + $0xf4] ss:$12 sps:$4 sm:$0xff]   ;;  %v1681_v39 = vld [vmem:[#allocation7 + $0xf0] ss:$12 sps:$4 sm:$0xff]   ;;  %v1688_v40 = vld [vmem:[#allocation7 + $0x10c] ss:$12 sps:$4 sm:$0xff]  }
  0x59   :  { %v1686_v41 = vld [vmem:[#allocation7 + $0x108] ss:$12 sps:$4 sm:$0xff]   ;;  %v1693_v42 = vld [vmem:[#allocation7 + $0x124] ss:$12 sps:$4 sm:$0xff]   ;;  %v1691_v43 = vld [vmem:[#allocation7 + $0x120] ss:$12 sps:$4 sm:$0xff]  }
  0x5a   :  { %900 = vmatpush1.bf16.msra.mxu0 %v1653_v11  ;;  %v1698_v44 = vld [vmem:[#allocation7 + $0x13c] ss:$12 sps:$4 sm:$0xff]   ;;  %v1696_v45 = vld [vmem:[#allocation7 + $0x138] ss:$12 sps:$4 sm:$0xff]   ;;  %v1703_v46 = vld [vmem:[#allocation7 + $0x154] ss:$12 sps:$4 sm:$0xff]  }
  0x5b   :  { %901 = vmatprep.subr.bf16.mxu0 %v1658_v12  ;;  %1528 = vmatpush3.bf16.msra.mxu1 %v1685_v23  ;;  %v1704_v47 = vld [vmem:[#allocation7 + $0x158] ss:$12 sps:$4 sm:$0xff]   ;;  %v1701_v48 = vld [vmem:[#allocation7 + $0x150] ss:$12 sps:$4 sm:$0xff]   ;;  %v1706_v52 = vld [vmem:[#allocation7 + $0x168] ss:$12 sps:$4 sm:$0xff]  }
  0x5c   :  { %1529 = vmatprep.subr.bf16.mxu1 %v1689_v25  ;;  %v1705_v49 = vld [vmem:[#allocation7 + $0x98] ss:$12 sps:$4 sm:$0xff]   ;;  %v1709_v51 = vld [vmem:[#allocation7 + $0x170] ss:$12 sps:$4 sm:$0xff]   ;;  %v1714_v55 = vld [vmem:[#allocation7 + $0x248] ss:$12 sps:$4 sm:$0xff]  }
  0x5d   :  { %v1708_v50 = vld [vmem:[#allocation7 + $0x16c] ss:$12 sps:$4 sm:$0xff]   ;;  %v1710_v53 = vld [vmem:[#allocation7 + $0xb0] ss:$12 sps:$4 sm:$0xff]   ;;  %v2029_v57 = vshrl.u32 %v91_v56, 7  ;;  %s1934_s10 = smov [#allocation10]  }
  0x5e   :  { %902 = vmatpush1.bf16.msra.mxu0 %v1656_v13  ;;  %v1713_v54 = vld [vmem:[#allocation7 + $0x184] ss:$12 sps:$4 sm:$0xff]   ;;  %v89_v59 = vld [vmem:[%s2086_s2] sm:$0xf]  ;;  %s1372_s11 = sshll.u32 %s1934_s10, 4  ;;  %s1373_s11 = int_to_ptr.vmem [resolvable:$true] %s1372_s11 }
  0x5f   :  { %903 = vmatprep.subr.bf16.mxu0 %v1661_v14  ;;  %1530 = vmatpush3.bf16.msra.mxu1 %v1690_v26  ;;  %v93_v58 = vsub.s32 0, %v2029_v57  ;;  %v97_v60 = vsub.s32 1, %v2029_v57  ;;  %v101_v61 = vsub.s32 2, %v2029_v57  ;;  %v105_v63 = vsub.s32 3, %v2029_v57  ;;  %v1745_v56 = vld [vmem:[#allocation7 + $0x218] ss:$12 sps:$4 sm:$0xff]   ;;  %p1896_p5 = scmp.lt.s32.totalorder %s1373_s11, %s1373_s11 }
  0x60   :  { %1531 = vmatprep.subr.bf16.mxu1 %v1694_v29  ;;  %v1792_v57 = vld [vmem:[#allocation8 + $0x88] sm:$0xff]  }
  0x61   :  { %v94_v62 = vrot.slane %v89_v59, %v93_v58  ;;  %v98_v0 = vrot.slane %v89_v59, %v97_v60  ;;  %v102_v2 = vrot.slane %v89_v59, %v101_v61  ;;  %v106_v5 = vrot.slane %v89_v59, %v105_v63  ;;  %v1748_v59 = vld [vmem:[#allocation7 + $0x22c] ss:$12 sps:$4 sm:$0xff]   ;;  %v1746_v63 = vld [vmem:[#allocation7 + $0x228] ss:$12 sps:$4 sm:$0xff]  }
  0x62   :  { %904 = vmatpush1.bf16.msra.mxu0 %v1659_v17 }
  0x63   :  { %905 = vmatprep.subr.bf16.mxu0 %v1664_v20  ;;  %1532 = vmatpush3.bf16.msra.mxu1 %v1695_v31  ;;  %v1719_v31 = vld [vmem:[#allocation7 + $0x260] ss:$12 sps:$4 sm:$0xff]  }
  0x64   :  { %1533 = vmatprep.subr.bf16.mxu1 %v1699_v33 }
  0x66   :  { %906 = vmatpush1.bf16.msra.mxu0 %v1662_v21 }
  0x67   :  { %907 = vmatprep.subr.bf16.mxu0 %v1667_v24  ;;  %1534 = vmatpush3.bf16.msra.mxu1 %v1700_v35  ;;  %v1716_v35 = vld [vmem:[#allocation7 + $0x198] ss:$12 sps:$4 sm:$0xff]  }
  0x68   :  { %1535 = vmatprep.subr.bf16.mxu1 %v1704_v47  ;;  %v1731_v47 = vld [vmem:[#allocation7 + $0x1e0] ss:$12 sps:$4 sm:$0xff]  }
  0x6a   :  { %908 = vmatpush1.bf16.msra.mxu0 %v1665_v27  ;;  %v1711_v27 = vld [vmem:[#allocation7 + $0x180] ss:$12 sps:$4 sm:$0xff]  }
  0x6b   :  { %909 = vmatprep.subr.bf16.mxu0 %v1670_v28  ;;  %1536 = vmatpush3.bf16.msra.mxu1 %v1705_v49  ;;  %v1715_v28 = vld [vmem:[#allocation7 + $0x188] ss:$12 sps:$4 sm:$0xff]  }
  0x6c   :  { %1537 = vmatprep.subr.bf16.mxu1 %v1709_v51  ;;  %v1738_v49 = vld [vmem:[#allocation7 + $0x1fc] ss:$12 sps:$4 sm:$0xff]   ;;  %v1736_v51 = vld [vmem:[#allocation7 + $0x1f8] ss:$12 sps:$4 sm:$0xff]  }
  0x6e   :  { %910 = vmatpush1.bf16.msra.mxu0 %v1668_v30  ;;  %v1718_v30 = vld [vmem:[#allocation7 + $0x19c] ss:$12 sps:$4 sm:$0xff]  }
  0x6f   :  { %911 = vmatprep.subr.bf16.mxu0 %v1673_v32  ;;  %1538 = vmatpush3.bf16.msra.mxu1 %v1710_v53  ;;  %v1743_v53 = vld [vmem:[#allocation7 + $0x214] ss:$12 sps:$4 sm:$0xff]  }
  0x70   :  { %1545 = vmatprep.subr.bf16.mxu1 %v1714_v55  ;;  %v1741_v55 = vld [vmem:[#allocation7 + $0x210] ss:$12 sps:$4 sm:$0xff]  }
  0x72   :  { %912 = vmatpush1.bf16.msra.mxu0 %v1671_v34 }
  0x73   :  { %913 = vmatprep.subr.bf16.mxu0 %v1678_v36  ;;  %v1720_v36 = vld [vmem:[#allocation7 + $0x1a0] ss:$12 sps:$4 sm:$0xff]  }
  0x76   :  { %914 = vmatpush1.bf16.msra.mxu0 %v1676_v37  ;;  %v1723_v37 = vld [vmem:[#allocation7 + $0x1b4] ss:$12 sps:$4 sm:$0xff]  }
  0x77   :  { %915 = vmatprep.subr.bf16.mxu0 %v1683_v38  ;;  %v1724_v38 = vld [vmem:[#allocation7 + $0x278] ss:$12 sps:$4 sm:$0xff]  }
  0x7a   :  { %916 = vmatpush1.bf16.msra.mxu0 %v1681_v39  ;;  %v1721_v39 = vld [vmem:[#allocation7 + $0x1b0] ss:$12 sps:$4 sm:$0xff]  }
  0x7b   :  { %917 = vmatprep.subr.bf16.mxu0 %v1688_v40  ;;  %v1725_v40 = vld [vmem:[#allocation7 + $0x1b8] ss:$12 sps:$4 sm:$0xff]  }
  0x7e   :  { %918 = vmatpush1.bf16.msra.mxu0 %v1686_v41  ;;  %v1728_v41 = vld [vmem:[#allocation7 + $0x1cc] ss:$12 sps:$4 sm:$0xff]  }
  0x7f   :  { %919 = vmatprep.subr.bf16.mxu0 %v1693_v42  ;;  %v1729_v42 = vld [vmem:[#allocation7 + $0x290] ss:$12 sps:$4 sm:$0xff]  }
  0x82   :  { %920 = vmatpush1.bf16.msra.mxu0 %v1691_v43  ;;  %v1726_v43 = vld [vmem:[#allocation7 + $0x1c8] ss:$12 sps:$4 sm:$0xff]  }
  0x83   :  { %921 = vmatprep.subr.bf16.mxu0 %v1698_v44  ;;  %v1730_v44 = vld [vmem:[#allocation7 + $0x1d0] ss:$12 sps:$4 sm:$0xff]  }
  0x86   :  { %922 = vmatpush1.bf16.msra.mxu0 %v1696_v45  ;;  %v1733_v45 = vld [vmem:[#allocation7 + $0x1e4] ss:$12 sps:$4 sm:$0xff]  }
  0x87   :  { %923 = vmatprep.subr.bf16.mxu0 %v1703_v46  ;;  %v1734_v46 = vld [vmem:[#allocation7 + $0x2a8] ss:$12 sps:$4 sm:$0xff]  }
  0x8a   :  { %924 = vmatpush1.bf16.msra.mxu0 %v1701_v48  ;;  %v1735_v48 = vld [vmem:[#allocation7 + $0x1e8] ss:$12 sps:$4 sm:$0xff]  }
  0x8b   :  { %925 = vmatprep.subr.bf16.mxu0 %v1708_v50  ;;  %v1739_v50 = vld [vmem:[#allocation7 + $0x2c0] ss:$12 sps:$4 sm:$0xff]  }
  0x8e   :  { %926 = vmatpush1.bf16.msra.mxu0 %v1706_v52  ;;  %v1740_v52 = vld [vmem:[#allocation7 + $0x200] ss:$12 sps:$4 sm:$0xff]  }
  0x8f   :  { %938 = vmatprep.subr.bf16.mxu0 %v1713_v54  ;;  %v1744_v54 = vld [vmem:[#allocation7 + $0x2d8] ss:$12 sps:$4 sm:$0xff]  }
 0x124   :  { %v174_v1 = vpop.f32.mrb[0].mxu0  ;;  %v217_v10 = vpop.f32.mrb[0].mxu1 }
 0x125   :  { %v175_v3 = vadd.f32 %v174_v1, %v94_v62  ;;  %v176_v4 = vpop.f32.mrb[1].mxu0  ;;  %v218_v12 = vadd.f32 %v217_v10, %v102_v2  ;;  %v219_v13 = vpop.f32.mrb[1].mxu1  ;;  %v1753_v1 = vld [vmem:[#allocation7 + $0x244] ss:$12 sps:$4 sm:$0xff]   ;;  %v1763_v10 = vld [vmem:[#allocation7 + $0x2a0] ss:$12 sps:$4 sm:$0xff]  }
 0x126   :  { %v177_v6 = vadd.f32 %v176_v4, %v98_v0  ;;  %v178_v7 = vpop.f32.mrb[2].mxu0  ;;  %v220_v16 = vadd.f32 %v219_v13, %v106_v5  ;;  %v221_v17 = vpop.f32.mrb[2].mxu1  ;;  %v1754_v4 = vld [vmem:[#allocation7 + $0x258] ss:$12 sps:$4 sm:$0xff]   ;;  %v1771_v13 = vld [vmem:[#allocation7 + $0x2d4] ss:$12 sps:$4 sm:$0xff]  }
 0x127   :  { %v179_v8 = vadd.f32 %v178_v7, %v94_v62  ;;  %v180_v9 = vpop.f32.mrb[3].mxu0  ;;  %v226_v14 = vmax.f32 %v175_v3, 0.0  ;;  %v228_v20 = vmax.f32 %v218_v12, 0.0  ;;  %v222_v21 = vadd.f32 %v221_v17, %v102_v2  ;;  %v223_v22 = vpop.f32.mrb[3].mxu1  ;;  %v1749_v62 = vld [vmem:[#allocation7 + $0x2f0] ss:$12 sps:$4 sm:$0xff]  }
 0x128   :  { %v181_v11 = vadd.f32 %v180_v9, %v98_v0  ;;  %v227_v18 = vmax.f32 %v177_v6, 0.0  ;;  %v229_v24 = vmax.f32 %v220_v16, 0.0  ;;  %v224_v25 = vadd.f32 %v223_v22, %v106_v5  ;;  %v1750_v0 = vld [vmem:[#allocation7 + $0x230] ss:$12 sps:$4 sm:$0xff]   ;;  %v1751_v2 = vld [vmem:[#allocation7 + $0x240] ss:$12 sps:$4 sm:$0xff]  }
 0x129   :  { %v230_v15 = vmax.f32 %v179_v8, 0.0  ;;  %v232_v29 = vmax.f32 %v222_v21, 0.0  ;;  %v1756_v3 = vld [vmem:[#allocation7 + $0x25c] ss:$12 sps:$4 sm:$0xff]   ;;  %v1759_v5 = vld [vmem:[#allocation7 + $0x274] ss:$12 sps:$4 sm:$0xff]  }
 0x12a   :  { %v231_v19 = vmax.f32 %v181_v11, 0.0  ;;  %v233_v32 = vmax.f32 %v224_v25, 0.0  ;;  %v1757_v6 = vld [vmem:[#allocation7 + $0x270] ss:$12 sps:$4 sm:$0xff]   ;;  %v1762_v7 = vld [vmem:[#allocation7 + $0x28c] ss:$12 sps:$4 sm:$0xff]  }
 0x12b   :  { %v234_v23 = vpack.c.bf16 %v230_v15, %v226_v14  ;;  %v2044_v33 = vpack.c.bf16 %v232_v29, %v228_v20  ;;  %v1760_v8 = vld [vmem:[#allocation7 + $0x288] ss:$12 sps:$4 sm:$0xff]   ;;  %v1765_v9 = vld [vmem:[#allocation7 + $0x2a4] ss:$12 sps:$4 sm:$0xff]   ;;  %v1774_v15 = vld [vmem:[#allocation7 + $0x2ec] ss:$12 sps:$4 sm:$0xff]  }
 0x12c   :  { %v235_v26 = vpack.c.bf16 %v231_v19, %v227_v18  ;;  %v237_v34 = vpack.c.bf16 %v233_v32, %v229_v24  ;;  %v1768_v11 = vld [vmem:[#allocation7 + $0x2bc] ss:$12 sps:$4 sm:$0xff]   ;;  %v1766_v12 = vld [vmem:[#allocation7 + $0x2b8] ss:$12 sps:$4 sm:$0xff]   ;;  %v1779_v21 = vld [vmem:[#allocation8 + $0x50] sm:$0xff]  }
 0x12d   :  { %v1769_v14 = vld [vmem:[#allocation7 + $0x2d0] ss:$12 sps:$4 sm:$0xff]   ;;  %v1772_v16 = vld [vmem:[#allocation7 + $0x2e8] ss:$12 sps:$4 sm:$0xff]   ;;  %v1775_v17 = vld [vmem:[#allocation8 + $0x40] sm:$0xff]  }
 0x12e   :  { %927 = vmatprep.mubr.bf16.mxu0 %v235_v26  ;;  %1013 = vmatprep.mubr.bf16.mxu1 %v235_v26  ;;  %v1776_v18 = vld [vmem:[#allocation8] sm:$0xff]   ;;  %v1777_v19 = vld [vmem:[#allocation8 + $0x48] sm:$0xff]   ;;  %v1780_v22 = vld [vmem:[#allocation8 + $0x10] sm:$0xff]  }
 0x12f   :  { %928 = vmatmul.mubr.bf16.vlgmr.msra.gmra.mrb[4].mxu0 %v234_v23  ;;  %1014 = vmatmul.mubr.bf16.vlgmr.msra.gmra.mrb[4].mxu1 %v234_v23  ;;  %v1778_v20 = vld [vmem:[#allocation8 + $0x8] sm:$0xff]   ;;  %v1781_v23 = vld [vmem:[#allocation8 + $0x58] sm:$0xff]   ;;  %v1783_v25 = vld [vmem:[#allocation8 + $0x60] sm:$0xff]  }
 0x130   :  { %939 = vmatpush1.bf16.msra.mxu0 %v1711_v27  ;;  %1546 = vmatpush3.bf16.msra.mxu1 %v1715_v28  ;;  %v1782_v24 = vld [vmem:[#allocation8 + $0x18] sm:$0xff]   ;;  %v1784_v26 = vld [vmem:[#allocation8 + $0x20] sm:$0xff]   ;;  %v1785_v27 = vld [vmem:[#allocation8 + $0x68] sm:$0xff]  }
 0x131   :  { %940 = vmatprep.subr.bf16.mxu0 %v1718_v30  ;;  %1547 = vmatprep.subr.bf16.mxu1 %v1719_v31  ;;  %v1786_v28 = vld [vmem:[#allocation8 + $0x28] sm:$0xff]   ;;  %v1787_v29 = vld [vmem:[#allocation8 + $0x70] sm:$0xff]   ;;  %v1789_v31 = vld [vmem:[#allocation8 + $0x78] sm:$0xff]  }
 0x132   :  { %1054 = vmatprep.mubr.bf16.mxu1 %v237_v34  ;;  %970 = vmatprep.mubr.bf16.mxu0 %v237_v34  ;;  %v1788_v30 = vld [vmem:[#allocation8 + $0x30] sm:$0xff]   ;;  %v1790_v32 = vld [vmem:[#allocation8 + $0x38] sm:$0xff]  }
 0x134   :  { %941 = vmatpush1.bf16.msra.mxu0 %v1716_v35  ;;  %1548 = vmatpush3.bf16.msra.mxu1 %v1720_v36 }
 0x135   :  { %942 = vmatprep.subr.bf16.mxu0 %v1723_v37  ;;  %1549 = vmatprep.subr.bf16.mxu1 %v1724_v38 }
 0x138   :  { %943 = vmatpush1.bf16.msra.mxu0 %v1721_v39  ;;  %1550 = vmatpush3.bf16.msra.mxu1 %v1725_v40  ;;  %v366_v40 = vld [vmem:[%s2088_s4] sm:$0x7] }
 0x139   :  { %944 = vmatprep.subr.bf16.mxu0 %v1728_v41  ;;  %1551 = vmatprep.subr.bf16.mxu1 %v1729_v42  ;;  %v379_v41 = vrot.slane %v366_v40, %v101_v61 }
 0x13c   :  { %945 = vmatpush1.bf16.msra.mxu0 %v1726_v43  ;;  %1552 = vmatpush3.bf16.msra.mxu1 %v1730_v44 }
 0x13d   :  { %946 = vmatprep.subr.bf16.mxu0 %v1733_v45  ;;  %1553 = vmatprep.subr.bf16.mxu1 %v1734_v46 }
 0x140   :  { %947 = vmatpush1.bf16.msra.mxu0 %v1731_v47  ;;  %1554 = vmatpush3.bf16.msra.mxu1 %v1735_v48 }
 0x141   :  { %948 = vmatprep.subr.bf16.mxu0 %v1738_v49  ;;  %1555 = vmatprep.subr.bf16.mxu1 %v1739_v50 }
 0x144   :  { %949 = vmatpush1.bf16.msra.mxu0 %v1736_v51  ;;  %1556 = vmatpush3.bf16.msra.mxu1 %v1740_v52 }
 0x145   :  { %950 = vmatprep.subr.bf16.mxu0 %v1743_v53  ;;  %1557 = vmatprep.subr.bf16.mxu1 %v1744_v54 }
 0x148   :  { %951 = vmatpush1.bf16.msra.mxu0 %v1741_v55  ;;  %1558 = vmatpush3.bf16.msra.mxu1 %v1745_v56  ;;  %v371_v55 = vrot.slane %v366_v40, %v93_v58  ;;  %v375_v56 = vrot.slane %v366_v40, %v97_v60  ;;  %v1793_v58 = vld [vmem:[#allocation8 + $0x90] sm:$0xff]   ;;  %v1794_v60 = vld [vmem:[#allocation8 + $0x98] sm:$0xff]  }
 0x149   :  { %952 = vmatprep.subr.bf16.mxu0 %v1748_v59  ;;  %1559 = vmatprep.subr.bf16.mxu1 %v1749_v62 }
 0x14c   :  { %953 = vmatpush1.bf16.msra.mxu0 %v1746_v63  ;;  %1560 = vmatpush3.bf16.msra.mxu1 %v1750_v0 }
 0x14d   :  { %954 = vmatprep.subr.bf16.mxu0 %v1753_v1  ;;  %1567 = vmatprep.subr.bf16.mxu1 %v1775_v17 }
 0x14f   :  { %1055 = vmatmul.mubr.bf16.vlgmr.msra.gmra.mrb[8].mxu1 %v2044_v33 }
 0x150   :  { %955 = vmatpush1.bf16.msra.mxu0 %v1751_v2  ;;  %1568 = vmatpush3.bf16.msra.mxu1 %v1776_v18 }
 0x151   :  { %956 = vmatprep.subr.bf16.mxu0 %v1756_v3  ;;  %1569 = vmatprep.subr.bf16.mxu1 %v1777_v19 }
 0x154   :  { %957 = vmatpush1.bf16.msra.mxu0 %v1754_v4  ;;  %1570 = vmatpush3.bf16.msra.mxu1 %v1778_v20 }
 0x155   :  { %958 = vmatprep.subr.bf16.mxu0 %v1759_v5  ;;  %1571 = vmatprep.subr.bf16.mxu1 %v1779_v21  ;;  %v1489_v21 = vld [vmem:[%s2090_s6] ss:$0 sm:$0xff]  ;;  %s1891_s6 = scalar_lea.vmem %s1373_s11, 128 }
 0x156   :  { %p1892_p4 = scmp.ne.s32.totalorder %s1373_s11, %s1891_s6  ;;  %p1897_p6 = scmp.lt.s32.totalorder %s1891_s6, %s1891_s6 }
 0x158   :  { %959 = vmatpush1.bf16.msra.mxu0 %v1757_v6  ;;  %1572 = vmatpush3.bf16.msra.mxu1 %v1780_v22  ;;  %p1898_p7 = por %p1897_p6, %p1896_p5 }
 0x159   :  { %960 = vmatprep.subr.bf16.mxu0 %v1762_v7  ;;  %1573 = vmatprep.subr.bf16.mxu1 %v1781_v23 }
 0x15a   :  { %p1899_p8 = pnand %p1898_p7, %p1892_p4 }
 0x15c   :  { %961 = vmatpush1.bf16.msra.mxu0 %v1760_v8  ;;  %1574 = vmatpush3.bf16.msra.mxu1 %v1782_v24 }
 0x15d   :  { %962 = vmatprep.subr.bf16.mxu0 %v1765_v9  ;;  %1575 = vmatprep.subr.bf16.mxu1 %v1783_v25 }
 0x160   :  { %963 = vmatpush1.bf16.msra.mxu0 %v1763_v10  ;;  %1576 = vmatpush3.bf16.msra.mxu1 %v1784_v26  ;;  %v1791_v10 = vld [vmem:[#allocation8 + $0x80] sm:$0xff]  }
 0x161   :  { %964 = vmatprep.subr.bf16.mxu0 %v1768_v11  ;;  %1577 = vmatprep.subr.bf16.mxu1 %v1785_v27  ;;  %v1795_v11 = vld [vmem:[#allocation8 + $0xa0] sm:$0xff]  }
 0x164   :  { %965 = vmatpush1.bf16.msra.mxu0 %v1766_v12  ;;  %1578 = vmatpush3.bf16.msra.mxu1 %v1786_v28  ;;  %v1796_v12 = vld [vmem:[#allocation8 + $0xa8] sm:$0xff]  }
 0x165   :  { %966 = vmatprep.subr.bf16.mxu0 %v1771_v13  ;;  %1579 = vmatprep.subr.bf16.mxu1 %v1787_v29  ;;  %v1797_v13 = vld [vmem:[#allocation8 + $0xb0] sm:$0xff]  }
 0x168   :  { %967 = vmatpush1.bf16.msra.mxu0 %v1769_v14  ;;  %1580 = vmatpush3.bf16.msra.mxu1 %v1788_v30  ;;  %v1798_v14 = vld [vmem:[#allocation8 + $0xb8] sm:$0xff]  }
 0x169   :  { %968 = vmatprep.subr.bf16.mxu0 %v1774_v15  ;;  %1581 = vmatprep.subr.bf16.mxu1 %v1789_v31 }
 0x16c   :  { %969 = vmatpush1.bf16.msra.mxu0 %v1772_v16  ;;  %1582 = vmatpush3.bf16.msra.mxu1 %v1790_v32 }
 0x16f   :  { %971 = vmatmul.mubr.bf16.vlgmr.msra.gmra.mrb[4].mxu0 %v2044_v33  ;;  %v1932_v33 = vmov 0.0  }
 0x170   :  { %1598 = vmatprep.subr.bf16.mxu1 %v1932_v33 }
 0x202   :  { %v1539_v34 = vpop.f32.mrb[4].mxu1 }
 0x203   :  { %v1540_v35 = vpop.f32.mrb[5].mxu1 }
 0x204   :  { %v1541_v36 = vadd.f32 %v1540_v35, %v1539_v34  ;;  %v1542_v37 = vpop.f32.mrb[6].mxu1 }
 0x205   :  { %v1543_v38 = vpop.f32.mrb[7].mxu1 }
 0x206   :  { %v1544_v39 = vadd.f32 %v1543_v38, %v1542_v37  ;;  %v1016_v44 = vadd.f32 %v1541_v36, %v379_v41 }
 0x208   :  { %v1019_v48 = vadd.f32 %v1544_v39, %v379_v41 }
 0x222   :  { %v1561_v42 = vpop.f32.mrb[8].mxu1 }
 0x223   :  { %v1562_v43 = vpop.f32.mrb[9].mxu1 }
 0x224   :  { %v1563_v45 = vadd.f32 %v1562_v43, %v1561_v42  ;;  %v1564_v46 = vpop.f32.mrb[10].mxu1 }
 0x225   :  { %v1565_v47 = vpop.f32.mrb[11].mxu1 }
 0x226   :  { %v1057_v49 = vadd.f32 %v1563_v45, %v1016_v44  ;;  %v1566_v50 = vadd.f32 %v1565_v47, %v1564_v46 }
 0x228   :  { %v1060_v51 = vadd.f32 %v1566_v50, %v1019_v48  ;;  %v1065_v52 = vmax.f32 %v1057_v49, 0.0 }
 0x22a   :  { %v1068_v53 = vmax.f32 %v1060_v51, 0.0 }
 0x22c   :  { %v1071_v54 = vpack.c.bf16 %v1068_v53, %v1065_v52 }
 0x242   :  { %v972_v61 = vpop.f32.mrb[4].mxu0 }
 0x243   :  { %v1618_v59 = vadd.f32 %v972_v61, %v371_v55  ;;  %v974_v62 = vpop.f32.mrb[5].mxu0 }
 0x244   :  { %v1619_v63 = vadd.f32 %v974_v62, %v375_v56  ;;  %v976_v0 = vpop.f32.mrb[6].mxu0 }
 0x245   :  { %v1620_v1 = vadd.f32 %v976_v0, %v371_v55  ;;  %v978_v2 = vpop.f32.mrb[7].mxu0  ;;  %v1063_v4 = vmax.f32 %v1618_v59, 0.0 }
 0x246   :  { %v1621_v3 = vadd.f32 %v978_v2, %v375_v56  ;;  %v1064_v6 = vmax.f32 %v1619_v63, 0.0 }
 0x247   :  { %v1066_v5 = vmax.f32 %v1620_v1, 0.0 }
 0x248   :  { %v1067_v7 = vmax.f32 %v1621_v3, 0.0 }
 0x249   :  { %v1069_v8 = vpack.c.bf16 %v1066_v5, %v1063_v4 }
 0x24a   :  { %v1070_v9 = vpack.c.bf16 %v1067_v7, %v1064_v6 }
 0x24c   :  { %1303 = vmatprep.mubr.bf16.mxu1 %v1070_v9 }
 0x24d   :  { %1304 = vmatmul.mubr.bf16.vlgmr.msra.gmra.mrb[12].mxu1 %v1069_v8 }
 0x24e   :  { %1599 = vmatpush3.bf16.msra.mxu1 %v1791_v10  ;;  %1614 = vmatprep.mubr.msk.bf16.mxu1 %vm1933_vm1, %v1932_v33 }
 0x24f   :  { %1600 = vmatprep.subr.bf16.mxu1 %v1932_v33 }
 0x252   :  { %1601 = vmatpush3.bf16.msra.mxu1 %v1792_v57 }
 0x253   :  { %1602 = vmatprep.subr.bf16.mxu1 %v1932_v33 }
 0x256   :  { %1603 = vmatpush3.bf16.msra.mxu1 %v1793_v58 }
 0x257   :  { %1604 = vmatprep.subr.bf16.mxu1 %v1932_v33 }
 0x25a   :  { %1605 = vmatpush3.bf16.msra.mxu1 %v1794_v60 }
 0x25b   :  { %1606 = vmatprep.subr.bf16.mxu1 %v1932_v33 }
 0x25e   :  { %1607 = vmatpush3.bf16.msra.mxu1 %v1795_v11 }
 0x25f   :  { %1608 = vmatprep.subr.bf16.mxu1 %v1932_v33 }
 0x262   :  { %1609 = vmatpush3.bf16.msra.mxu1 %v1796_v12 }
 0x263   :  { %1610 = vmatprep.subr.bf16.mxu1 %v1932_v33 }
 0x266   :  { %1611 = vmatpush3.bf16.msra.mxu1 %v1797_v13 }
 0x267   :  { %1612 = vmatprep.subr.bf16.mxu1 %v1932_v33 }
 0x26a   :  { %1613 = vmatpush3.bf16.msra.mxu1 %v1798_v14 }
 0x26d   :  { %1615 = vmatmul.mubr.bf16.vlgmr.msra.gmra.mrb[16].mxu1 %v1071_v54 }
 0x320   :  { %v1583_v15 = vpop.f32.mrb[12].mxu1 }
 0x321   :  { %v1584_v16 = vpop.f32.mrb[13].mxu1 }
 0x322   :  { %v1585_v17 = vadd.f32 %v1584_v16, %v1583_v15  ;;  %v1586_v18 = vpop.f32.mrb[14].mxu1 }
 0x323   :  { %v1587_v19 = vpop.f32.mrb[15].mxu1 }
 0x324   :  { %v1588_v20 = vadd.f32 %v1587_v19, %v1586_v18  ;;  %v1306_v22 = vadd.f32 %v1585_v17, %v1489_v21 }
 0x326   :  { %v1309_v26 = vadd.f32 %v1588_v20, %v1489_v21 }
 0x340   :  { %v1346_v23 = vpop.f32.mrb[16].mxu1 }
 0x341   :  { %v1347_v24 = vadd.f32 %v1346_v23, %v1306_v22  ;;  %v1616_v25 = vpop.f32.mrb[17].mxu1 }
 0x342   :  { %v1349_v27 = vpop.f32.mrb[18].mxu1 }
 0x343   :  { %1799 = vtanh.f32 %v1347_v24  ;;  %v1350_v28 = vadd.f32 %v1349_v27, %v1309_v26  ;;  %v1617_v29 = vpop.f32.mrb[19].mxu1 }
 0x345   :  { %1801 = vtanh.f32 %v1350_v28 }
 0x34d   :  { %v1800_v30 = vpop.eup %1799 }
 0x34e   :  { %v1355_v32 = vmul.f32 2.0, %v1800_v30 }
 0x34f   :  { %v1802_v31 = vpop.eup %1801 }
 0x350   :  { %v1356_v33 = vmul.f32 2.0, %v1802_v31 }
 0x352   :  { %v1521_v34 = vpack.c.bf16 %v1356_v33, %v1355_v32 }
 0x354   :  { %1522 = vst [vmem:[#allocation10] sm:$0xff] %v1521_v34  }
 0x355   :  { %1902 = shalt.err (!%p1899_p8)
}
 0x356   :  { %s1903_s14 = scalar_lea.hbm %s2091_s7, 128 }
 0x357   :  { %p1904_p9 = scmp.ne.s32.totalorder %s2091_s7, %s1903_s14  ;;  %p1907_p10 = scmp.lt.u32.totalorder %s1903_s14, %s2091_s7 }
 0x359   :  { %p1909_p11 = pnand %p1907_p10, %p1904_p9 }
 0x35b   :  { %1912 = shalt.err (!%p1909_p11)
}
 0x35c   :  { %1378 = dma.vmem_to_hbm [thread:$0]  %s1373_s11, 128, %s2091_s7, [#allocation4], %s1925_s1, %s1925_s1, %s1926_s25  }
 0x35d   :  { %1919 = dma.done.wait [#allocation4], 128  }
 0x35e   :  { %1920 = vsyncadd [#allocation4], 4294967168 }
 0x35f   :  { %1382 = vsyncpa [#allocation3], 1 }
 0x360   :  { %1383 = vsyncpa [#allocation6], 1 }
 0x361   :  { %1384 = vsyncpa [#allocation9], 1 }
 0x362   :  { %1385 = vsyncpa [#allocation4], 1 }

</bundles_post_ra>
